<compile_context>
chip_gen: v6e
topology: v6e:2x2x1
jax: 0.10.0
libtpu: 0.0.40
codegen_flags: <defaults>
</compile_context>

<pallas_src>
import math

import jax
import jax.numpy as jnp
from jax.experimental import pallas as pl
from jax.experimental.pallas import tpu as pltpu


def _round_up(x, m):
    return ((x + m - 1) // m) * m


def _cdiv(a, b):
    return -(-a // b)


# ------------------------------ kernel body ------------------------------

def _make_qmodel_kernel(n_mid, compute_dtype):
    """n_mid = number of hidden->hidden Linear layers (statically unrolled)."""

    def kernel(x_ref, w_in_ref, b_in_ref, w_mid_ref, b_mid_ref,
               w_out_ref, b_out_ref, o_ref):
        # layer 0: (TB, d_in_p) @ (d_in_p, F_hid) -> f32 accumulate, + bias, ReLU
        h = jnp.dot(x_ref[...].astype(compute_dtype), w_in_ref[...],
                    preferred_element_type=jnp.float32) + b_in_ref[...]
        h = jnp.maximum(h, 0.0)
        # middle layers: (TB, F_hid) @ (F_hid, F_hid)
        for l in range(n_mid):                       # statically unrolled
            h = jnp.dot(h.astype(compute_dtype), w_mid_ref[l],
                        preferred_element_type=jnp.float32) + b_mid_ref[l]
            h = jnp.maximum(h, 0.0)
        # output layer: (TB, F_hid) @ (F_hid, F_out), no ReLU
        y = jnp.dot(h.astype(compute_dtype), w_out_ref[...],
                    preferred_element_type=jnp.float32) + b_out_ref[...]
        o_ref[...] = y.astype(o_ref.dtype)           # lane-dense (TB, F_out) store

    return kernel


# --------------------------- tiling / VMEM policy ---------------------------

def _vmem_policy():
    """Returns (vmem_limit_bytes, working_set_budget_bytes) per generation."""
    try:
        kind = jax.devices()[0].device_kind.lower()
    except Exception:
        kind = ""
    mib = 1024 * 1024
    if "v7" in kind:
        # 64 MiB physical VMEM per TensorCore -> leave headroom.
        return 56 * mib, 44 * mib
    if "v5" in kind or "v6" in kind or "v4" in kind:
        # 128 MiB physical; raise well above the 16/32 MiB scoped defaults.
        return 100 * mib, 80 * mib
    # Unknown device -> be conservative (v7x-like).
    return 56 * mib, 44 * mib


def _choose_tiling(B, d_in_p, F_hid, F_out, slab_bytes):
    vmem_limit, budget = _vmem_policy()
    reserve = 2 * 1024 * 1024
    # VMEM bytes per batch row:
    #   2x x tile (f32, double buffered) + 2x out tile (f32, double buffered)
    #   + ~2 live f32 intermediates of width F_hid + one bf16 cast copy.
    per_row = 8 * d_in_p + 8 * F_out + 10 * F_hid
    avail = budget - 2 * slab_bytes - reserve        # slabs counted x2 for safety
    if avail < 8 * per_row:
        tile_cap = 8
    else:
        tile_cap = max(8, (avail // per_row) // 8 * 8)
    tile_cap = min(tile_cap, 1024)                   # ~85% of HBM roofline already
    if B >= 2048:
        tile_cap = min(tile_cap, 512)                # >=4 steps: pipeline + 2-TC friendly
    n_steps = max(1, _cdiv(B, tile_cap))
    tile_b = _round_up(_cdiv(B, n_steps), 8)         # minimize last-tile padding
    B_pad = n_steps * tile_b
    return tile_b, n_steps, B_pad, vmem_limit


# ------------------------------ forward pass ------------------------------

def qmodel_forward(x, packed):
    """Fused MLP forward.  x: (B, d_in) f32 -> (B, d_out) f32."""
    B, d_in = x.shape
    assert d_in == packed["d_in"]
    d_in_p, d_out = packed["d_in_p"], packed["d_out"]
    F_hid, F_out, n_mid = packed["F_hid"], packed["F_out"], packed["n_mid"]
    w_in, b_in = packed["w_in"], packed["b_in"]
    w_mid, b_mid = packed["w_mid"], packed["b_mid"]
    w_out, b_out = packed["w_out"], packed["b_out"]
    n_mid_slab = w_mid.shape[0]
    compute_dtype = w_in.dtype

    w_itemsize = jnp.dtype(compute_dtype).itemsize
    slab_bytes = ((w_in.size + w_mid.size + w_out.size) * w_itemsize
                  + (b_in.size + b_mid.size + b_out.size) * 4)

    tile_b, n_steps, B_pad, vmem_limit = _choose_tiling(
        B, d_in_p, F_hid, F_out, slab_bytes)

    # Pad x: columns only to a sublane multiple (keeps HBM read of x minimal),
    # rows to n_steps * tile_b (padding chosen to be minimal above).
    if d_in != d_in_p or B != B_pad:
        x = jnp.pad(x, ((0, B_pad - B), (0, d_in_p - d_in)))

    flops = 2 * B_pad * (d_in_p * F_hid + n_mid * F_hid * F_hid + F_hid * F_out)
    bytes_accessed = (x.size * 4 + B_pad * F_out * 4 + slab_bytes)
    cost = pl.CostEstimate(flops=flops, transcendentals=0,
                           bytes_accessed=bytes_accessed)

    def build_call(use_buffered):
        def slab_spec(shape):
            nd = len(shape)
            idx = lambda i: (0,) * nd
            if use_buffered:
                # Constant index map -> fetched once; single-buffer to halve VMEM.
                return pl.BlockSpec(shape, idx, pipeline_mode=pl.Buffered(1))
            return pl.BlockSpec(shape, idx)

        return pl.pallas_call(
            _make_qmodel_kernel(n_mid, compute_dtype),
            out_shape=jax.ShapeDtypeStruct((B_pad, F_out), jnp.float32),
            grid_spec=pltpu.PrefetchScalarGridSpec(
                num_scalar_prefetch=0,
                grid=(n_steps,),
                in_specs=[
                    pl.BlockSpec((tile_b, d_in_p), lambda i: (i, 0)),   # x tile
                    slab_spec((d_in_p, F_hid)),                         # w_in
                    slab_spec((1, F_hid)),                              # b_in
                    slab_spec((n_mid_slab, F_hid, F_hid)),              # w_mid slab
                    slab_spec((n_mid_slab, 1, F_hid)),                  # b_mid slab
                    slab_spec((F_hid, F_out)),                          # w_out
                    slab_spec((1, F_out)),                              # b_out
                ],
                out_specs=pl.BlockSpec((tile_b, F_out), lambda i: (i, 0)),
            ),
            compiler_params=pltpu.CompilerParams(
                dimension_semantics=("parallel",),
                vmem_limit_bytes=vmem_limit,
            ),
            cost_estimate=cost,
        )

    args = (x, w_in, b_in, w_mid, b_mid, w_out, b_out)
    try:
        out_padded = build_call(use_buffered=True)(*args)
    except Exception:
        # Fallback if this runtime rejects pipeline_mode=pl.Buffered(1).
        out_padded = build_call(use_buffered=False)(*args)

    return out_padded[:B, :d_out]


# ------------------------- parameter construction -------------------------

def init_qmodel_params(key, input_shape, output_shape, layer_sizes):
    """torch.nn.Linear-style U(-1/sqrt(fan_in), 1/sqrt(fan_in)) init,
    weights stored as (in_features, out_features)."""
    dims = [input_shape] + list(layer_sizes) + [output_shape]
    keys = jax.random.split(key, len(dims) - 1)
    ws, bs = [], []
    for k, fan_in, fan_out in zip(keys, dims[:-1], dims[1:]):
        bound = 1.0 / math.sqrt(fan_in)
        kw, kb = jax.random.split(k)
        ws.append(jax.random.uniform(kw, (fan_in, fan_out), jnp.float32, -bound, bound))
        bs.append(jax.random.uniform(kb, (1, fan_out), jnp.float32, -bound, bound))
    return ws, bs


def pack_qmodel_params(ws, bs, *, weight_dtype=jnp.bfloat16):
    """Zero-pad each layer to its own lane-dense shape and pack the middle
    (hidden->hidden) layers into one slab.  Zero padding is exact: padded
    weight rows/cols and padded bias lanes are zero and ReLU(0)=0, so padded
    lanes stay zero through every layer before the final slice."""
    dims_in = [w.shape[0] for w in ws]
    dims_out = [w.shape[1] for w in ws]
    L = len(ws)
    assert L >= 2, "QModel always has an input and an output Linear layer"

    d_in = dims_in[0]
    d_in_p = _round_up(d_in, 8)                       # sublane-aligned input width
    d_out = dims_out[-1]
    F_out = _round_up(d_out, 128)                     # lane-dense output width
    F_hid = _round_up(max(dims_out[:-1] + dims_in[1:]), 128)  # lane-dense hidden width
    n_mid = L - 2
    n_mid_slab = max(n_mid, 1)

    w_in = jnp.zeros((d_in_p, F_hid), weight_dtype)
    w_in = w_in.at[:d_in, :dims_out[0]].set(ws[0].astype(weight_dtype))
    b_in = jnp.zeros((1, F_hid), jnp.float32).at[:, :dims_out[0]].set(bs[0])

    w_mid = jnp.zeros((n_mid_slab, F_hid, F_hid), weight_dtype)
    b_mid = jnp.zeros((n_mid_slab, 1, F_hid), jnp.float32)
    for l in range(n_mid):
        w, b = ws[1 + l], bs[1 + l]
        w_mid = w_mid.at[l, :w.shape[0], :w.shape[1]].set(w.astype(weight_dtype))
        b_mid = b_mid.at[l, :, :w.shape[1]].set(b)

    w_out = jnp.zeros((F_hid, F_out), weight_dtype)
    w_out = w_out.at[:dims_in[-1], :d_out].set(ws[-1].astype(weight_dtype))
    b_out = jnp.zeros((1, F_out), jnp.float32).at[:, :d_out].set(bs[-1])

    return dict(w_in=w_in, b_in=b_in, w_mid=w_mid, b_mid=b_mid,
                w_out=w_out, b_out=b_out,
                d_in=d_in, d_in_p=d_in_p, d_out=d_out,
                F_hid=F_hid, F_out=F_out, n_mid=n_mid)


def qmodel_reference(x, ws, bs, compute_dtype=jnp.float32):
    """Plain-JAX reference.  With compute_dtype=bf16 it mirrors the kernel's
    bf16-operand / f32-accumulate numerics."""
    h = x
    for i, (w, b) in enumerate(zip(ws, bs)):
        h = jnp.dot(h.astype(compute_dtype), w.astype(compute_dtype),
                    preferred_element_type=jnp.float32) + b
        if i < len(ws) - 1:
            h = jnp.maximum(h, 0.0)
    return h


# ----------------------------------- demo -----------------------------------

if __name__ == "__main__":
    key = jax.random.PRNGKey(0)
    k_params, k_x = jax.random.split(key)

    # Small DDQN-style shapes: state dim 16, two hidden layers of 32, 4 actions.
    input_shape = 16
    output_shape = 4
    layer_sizes = [32, 32]
    batch = 8

    ws, bs = init_qmodel_params(k_params, input_shape, output_shape, layer_sizes)
    packed = pack_qmodel_params(ws, bs)                     # bf16 weights
    x = jax.random.normal(k_x, (batch, input_shape), jnp.float32)

    out = qmodel_forward(x, packed)
    out = jax.block_until_ready(out)
    assert out.shape == (batch, output_shape)

    # Exact-numerics check (reference mirrors bf16 operands / f32 accumulation).
    ref_bf16 = qmodel_reference(x, ws, bs, compute_dtype=jnp.bfloat16)
    assert jnp.allclose(out, ref_bf16, atol=2e-3, rtol=2e-3), "mismatch vs bf16 reference"

    # Sanity check against full-f32 math (bf16 weight quantization tolerance).
    ref_f32 = qmodel_reference(x, ws, bs, compute_dtype=jnp.float32)
    assert jnp.allclose(out, ref_f32, atol=5e-2, rtol=5e-2), "mismatch vs f32 reference"

    print("KERNEL_OK")
</pallas_src>

<mosaic_0001>
module attributes {stable_mosaic.version = 11 : i64} {
  func.func @kernel(%arg0: i32, %arg1: memref<8x16xf32, #tpu.memory_space<vmem>>, %arg2: memref<16x128xbf16, #tpu.memory_space<vmem>>, %arg3: memref<1x128xf32, #tpu.memory_space<vmem>>, %arg4: memref<1x128x128xbf16, #tpu.memory_space<vmem>>, %arg5: memref<1x1x128xf32, #tpu.memory_space<vmem>>, %arg6: memref<128x128xbf16, #tpu.memory_space<vmem>>, %arg7: memref<1x128xf32, #tpu.memory_space<vmem>>, %arg8: memref<8x128xf32, #tpu.memory_space<vmem>>) attributes {dimension_semantics = [#tpu.dimension_semantics<parallel>], iteration_bounds = array<i64: 1>, scalar_prefetch = 0 : i64, scratch_operands = 0 : i64, tpu.core_type = #tpu.core_type<tc>, window_params = [{transform_indices = @transform_0, window_bounds = array<i64: 8, 16>}, {pipeline_mode = #tpu.pipeline_mode<synchronous>, transform_indices = @transform_1, window_bounds = array<i64: 16, 128>}, {pipeline_mode = #tpu.pipeline_mode<synchronous>, transform_indices = @transform_2, window_bounds = array<i64: 1, 128>}, {pipeline_mode = #tpu.pipeline_mode<synchronous>, transform_indices = @transform_3, window_bounds = array<i64: 1, 128, 128>}, {pipeline_mode = #tpu.pipeline_mode<synchronous>, transform_indices = @transform_4, window_bounds = array<i64: 1, 1, 128>}, {pipeline_mode = #tpu.pipeline_mode<synchronous>, transform_indices = @transform_5, window_bounds = array<i64: 128, 128>}, {pipeline_mode = #tpu.pipeline_mode<synchronous>, transform_indices = @transform_6, window_bounds = array<i64: 1, 128>}, {transform_indices = @transform_7, window_bounds = array<i64: 8, 128>}]} {
    %c0 = arith.constant 0 : index
    %c0_0 = arith.constant 0 : index
    %0 = vector.load %arg1[%c0, %c0_0] : memref<8x16xf32, #tpu.memory_space<vmem>>, vector<8x16xf32>
    %1 = arith.truncf %0 : vector<8x16xf32> to vector<8x16xbf16>
    %c0_1 = arith.constant 0 : index
    %c0_2 = arith.constant 0 : index
    %2 = vector.load %arg2[%c0_1, %c0_2] : memref<16x128xbf16, #tpu.memory_space<vmem>>, vector<16x128xbf16>
    %cst = arith.constant dense<0.000000e+00> : vector<8x128xf32>
    %3 = tpu.matmul %1, %2, %cst {dimension_numbers = #tpu.dot_dimension_numbers<[1], [0], [0], [1], [0, 0, 1, 1], [], []>} : vector<8x16xbf16>, vector<16x128xbf16>, vector<8x128xf32> -> vector<8x128xf32>
    %c0_3 = arith.constant 0 : index
    %c0_4 = arith.constant 0 : index
    %4 = vector.load %arg3[%c0_3, %c0_4] : memref<1x128xf32, #tpu.memory_space<vmem>>, vector<1x128xf32>
    %5 = vector.broadcast %4 : vector<1x128xf32> to vector<8x128xf32>
    %6 = arith.addf %3, %5 : vector<8x128xf32>
    %cst_5 = arith.constant 0.000000e+00 : f32
    %7 = vector.broadcast %cst_5 : f32 to vector<8x128xf32>
    %8 = arith.maximumf %6, %7 : vector<8x128xf32>
    %9 = arith.truncf %8 : vector<8x128xf32> to vector<8x128xbf16>
    %c0_6 = arith.constant 0 : index
    %c0_7 = arith.constant 0 : index
    %c0_8 = arith.constant 0 : index
    %10 = vector.load %arg4[%c0_6, %c0_7, %c0_8] : memref<1x128x128xbf16, #tpu.memory_space<vmem>>, vector<1x128x128xbf16>
    %11 = vector.shape_cast %10 : vector<1x128x128xbf16> to vector<128x128xbf16>
    %cst_9 = arith.constant dense<0.000000e+00> : vector<8x128xf32>
    %12 = tpu.matmul %9, %11, %cst_9 {dimension_numbers = #tpu.dot_dimension_numbers<[1], [0], [0], [1], [0, 0, 1, 1], [], []>} : vector<8x128xbf16>, vector<128x128xbf16>, vector<8x128xf32> -> vector<8x128xf32>
    %c0_10 = arith.constant 0 : index
    %c0_11 = arith.constant 0 : index
    %c0_12 = arith.constant 0 : index
    %13 = vector.load %arg5[%c0_10, %c0_11, %c0_12] : memref<1x1x128xf32, #tpu.memory_space<vmem>>, vector<1x1x128xf32>
    %14 = vector.shape_cast %13 : vector<1x1x128xf32> to vector<1x128xf32>
    %15 = vector.broadcast %14 : vector<1x128xf32> to vector<8x128xf32>
    %16 = arith.addf %12, %15 : vector<8x128xf32>
    %cst_13 = arith.constant 0.000000e+00 : f32
    %17 = vector.broadcast %cst_13 : f32 to vector<8x128xf32>
    %18 = arith.maximumf %16, %17 : vector<8x128xf32>
    %19 = arith.truncf %18 : vector<8x128xf32> to vector<8x128xbf16>
    %c0_14 = arith.constant 0 : index
    %c0_15 = arith.constant 0 : index
    %20 = vector.load %arg6[%c0_14, %c0_15] : memref<128x128xbf16, #tpu.memory_space<vmem>>, vector<128x128xbf16>
    %cst_16 = arith.constant dense<0.000000e+00> : vector<8x128xf32>
    %21 = tpu.matmul %19, %20, %cst_16 {dimension_numbers = #tpu.dot_dimension_numbers<[1], [0], [0], [1], [0, 0, 1, 1], [], []>} : vector<8x128xbf16>, vector<128x128xbf16>, vector<8x128xf32> -> vector<8x128xf32>
    %c0_17 = arith.constant 0 : index
    %c0_18 = arith.constant 0 : index
    %22 = vector.load %arg7[%c0_17, %c0_18] : memref<1x128xf32, #tpu.memory_space<vmem>>, vector<1x128xf32>
    %23 = vector.broadcast %22 : vector<1x128xf32> to vector<8x128xf32>
    %24 = arith.addf %21, %23 : vector<8x128xf32>
    %c0_19 = arith.constant 0 : index
    %c0_20 = arith.constant 0 : index
    %25 = vector.load %arg8[%c0_19, %c0_20] : memref<8x128xf32, #tpu.memory_space<vmem>>, vector<8x128xf32>
    tpu.vector_store %arg8[%c0_19, %c0_20], %24 {strides = array<i32>} : memref<8x128xf32, #tpu.memory_space<vmem>>, vector<8x128xf32>,
    return
  }
  func.func @transform_0(%arg0: i32) -> (i32, i32) {
    %c0_i32 = arith.constant 0 : i32
    %c0_i32_0 = arith.constant 0 : i32
    return %arg0, %c0_i32 : i32, i32
  }
  func.func @transform_1(%arg0: i32) -> (i32, i32) {
    %c0_i32 = arith.constant 0 : i32
    %c0_i32_0 = arith.constant 0 : i32
    %c0_i32_1 = arith.constant 0 : i32
    return %c0_i32, %c0_i32_0 : i32, i32
  }
  func.func @transform_2(%arg0: i32) -> (i32, i32) {
    %c0_i32 = arith.constant 0 : i32
    %c0_i32_0 = arith.constant 0 : i32
    %c0_i32_1 = arith.constant 0 : i32
    return %c0_i32, %c0_i32_0 : i32, i32
  }
  func.func @transform_3(%arg0: i32) -> (i32, i32, i32) {
    %c0_i32 = arith.constant 0 : i32
    %c0_i32_0 = arith.constant 0 : i32
    %c0_i32_1 = arith.constant 0 : i32
    %c0_i32_2 = arith.constant 0 : i32
    return %c0_i32, %c0_i32_0, %c0_i32_1 : i32, i32, i32
  }
  func.func @transform_4(%arg0: i32) -> (i32, i32, i32) {
    %c0_i32 = arith.constant 0 : i32
    %c0_i32_0 = arith.constant 0 : i32
    %c0_i32_1 = arith.constant 0 : i32
    %c0_i32_2 = arith.constant 0 : i32
    return %c0_i32, %c0_i32_0, %c0_i32_1 : i32, i32, i32
  }
  func.func @transform_5(%arg0: i32) -> (i32, i32) {
    %c0_i32 = arith.constant 0 : i32
    %c0_i32_0 = arith.constant 0 : i32
    %c0_i32_1 = arith.constant 0 : i32
    return %c0_i32, %c0_i32_0 : i32, i32
  }
  func.func @transform_6(%arg0: i32) -> (i32, i32) {
    %c0_i32 = arith.constant 0 : i32
    %c0_i32_0 = arith.constant 0 : i32
    %c0_i32_1 = arith.constant 0 : i32
    return %c0_i32, %c0_i32_0 : i32, i32
  }
  func.func @transform_7(%arg0: i32) -> (i32, i32) {
    %c0_i32 = arith.constant 0 : i32
    %c0_i32_0 = arith.constant 0 : i32
    return %arg0, %c0_i32 : i32, i32
  }
}

module attributes {stable_mosaic.version = 11 : i64} {
  func.func @kernel(%arg0: i32, %arg1: memref<8x16xf32, #tpu.memory_space<vmem>>, %arg2: memref<16x128xbf16, #tpu.memory_space<vmem>>, %arg3: memref<1x128xf32, #tpu.memory_space<vmem>>, %arg4: memref<1x128x128xbf16, #tpu.memory_space<vmem>>, %arg5: memref<1x1x128xf32, #tpu.memory_space<vmem>>, %arg6: memref<128x128xbf16, #tpu.memory_space<vmem>>, %arg7: memref<1x128xf32, #tpu.memory_space<vmem>>, %arg8: memref<8x128xf32, #tpu.memory_space<vmem>>) attributes {dimension_semantics = [#tpu.dimension_semantics<parallel>], iteration_bounds = array<i64: 1>, scalar_prefetch = 0 : i64, scratch_operands = 0 : i64, tpu.core_type = #tpu.core_type<tc>, window_params = [{transform_indices = @transform_0, window_bounds = array<i64: 8, 16>}, {pipeline_mode = #tpu.pipeline_mode<synchronous>, transform_indices = @transform_1, window_bounds = array<i64: 16, 128>}, {pipeline_mode = #tpu.pipeline_mode<synchronous>, transform_indices = @transform_2, window_bounds = array<i64: 1, 128>}, {pipeline_mode = #tpu.pipeline_mode<synchronous>, transform_indices = @transform_3, window_bounds = array<i64: 1, 128, 128>}, {pipeline_mode = #tpu.pipeline_mode<synchronous>, transform_indices = @transform_4, window_bounds = array<i64: 1, 1, 128>}, {pipeline_mode = #tpu.pipeline_mode<synchronous>, transform_indices = @transform_5, window_bounds = array<i64: 128, 128>}, {pipeline_mode = #tpu.pipeline_mode<synchronous>, transform_indices = @transform_6, window_bounds = array<i64: 1, 128>}, {transform_indices = @transform_7, window_bounds = array<i64: 8, 128>}]} {
    %c0 = arith.constant 0 : index
    %c0_0 = arith.constant 0 : index
    %0 = vector.load %arg1[%c0, %c0_0] : memref<8x16xf32, #tpu.memory_space<vmem>>, vector<8x16xf32>
    %1 = arith.truncf %0 : vector<8x16xf32> to vector<8x16xbf16>
    %c0_1 = arith.constant 0 : index
    %c0_2 = arith.constant 0 : index
    %2 = vector.load %arg2[%c0_1, %c0_2] : memref<16x128xbf16, #tpu.memory_space<vmem>>, vector<16x128xbf16>
    %cst = arith.constant dense<0.000000e+00> : vector<8x128xf32>
    %3 = tpu.matmul %1, %2, %cst {dimension_numbers = #tpu.dot_dimension_numbers<[1], [0], [0], [1], [0, 0, 1, 1], [], []>} : vector<8x16xbf16>, vector<16x128xbf16>, vector<8x128xf32> -> vector<8x128xf32>
    %c0_3 = arith.constant 0 : index
    %c0_4 = arith.constant 0 : index
    %4 = vector.load %arg3[%c0_3, %c0_4] : memref<1x128xf32, #tpu.memory_space<vmem>>, vector<1x128xf32>
    %5 = vector.broadcast %4 : vector<1x128xf32> to vector<8x128xf32>
    %6 = arith.addf %3, %5 : vector<8x128xf32>
    %cst_5 = arith.constant 0.000000e+00 : f32
    %7 = vector.broadcast %cst_5 : f32 to vector<8x128xf32>
    %8 = arith.maximumf %6, %7 : vector<8x128xf32>
    %9 = arith.truncf %8 : vector<8x128xf32> to vector<8x128xbf16>
    %c0_6 = arith.constant 0 : index
    %c0_7 = arith.constant 0 : index
    %c0_8 = arith.constant 0 : index
    %10 = vector.load %arg4[%c0_6, %c0_7, %c0_8] : memref<1x128x128xbf16, #tpu.memory_space<vmem>>, vector<1x128x128xbf16>
    %11 = vector.shape_cast %10 : vector<1x128x128xbf16> to vector<128x128xbf16>
    %cst_9 = arith.constant dense<0.000000e+00> : vector<8x128xf32>
    %12 = tpu.matmul %9, %11, %cst_9 {dimension_numbers = #tpu.dot_dimension_numbers<[1], [0], [0], [1], [0, 0, 1, 1], [], []>} : vector<8x128xbf16>, vector<128x128xbf16>, vector<8x128xf32> -> vector<8x128xf32>
    %c0_10 = arith.constant 0 : index
    %c0_11 = arith.constant 0 : index
    %c0_12 = arith.constant 0 : index
    %13 = vector.load %arg5[%c0_10, %c0_11, %c0_12] : memref<1x1x128xf32, #tpu.memory_space<vmem>>, vector<1x1x128xf32>
    %14 = vector.shape_cast %13 : vector<1x1x128xf32> to vector<1x128xf32>
    %15 = vector.broadcast %14 : vector<1x128xf32> to vector<8x128xf32>
    %16 = arith.addf %12, %15 : vector<8x128xf32>
    %cst_13 = arith.constant 0.000000e+00 : f32
    %17 = vector.broadcast %cst_13 : f32 to vector<8x128xf32>
    %18 = arith.maximumf %16, %17 : vector<8x128xf32>
    %19 = arith.truncf %18 : vector<8x128xf32> to vector<8x128xbf16>
    %c0_14 = arith.constant 0 : index
    %c0_15 = arith.constant 0 : index
    %20 = vector.load %arg6[%c0_14, %c0_15] : memref<128x128xbf16, #tpu.memory_space<vmem>>, vector<128x128xbf16>
    %cst_16 = arith.constant dense<0.000000e+00> : vector<8x128xf32>
    %21 = tpu.matmul %19, %20, %cst_16 {dimension_numbers = #tpu.dot_dimension_numbers<[1], [0], [0], [1], [0, 0, 1, 1], [], []>} : vector<8x128xbf16>, vector<128x128xbf16>, vector<8x128xf32> -> vector<8x128xf32>
    %c0_17 = arith.constant 0 : index
    %c0_18 = arith.constant 0 : index
    %22 = vector.load %arg7[%c0_17, %c0_18] : memref<1x128xf32, #tpu.memory_space<vmem>>, vector<1x128xf32>
    %23 = vector.broadcast %22 : vector<1x128xf32> to vector<8x128xf32>
    %24 = arith.addf %21, %23 : vector<8x128xf32>
    %c0_19 = arith.constant 0 : index
    %c0_20 = arith.constant 0 : index
    %25 = vector.load %arg8[%c0_19, %c0_20] : memref<8x128xf32, #tpu.memory_space<vmem>>, vector<8x128xf32>
    tpu.vector_store %arg8[%c0_19, %c0_20], %24 {strides = array<i32>} : memref<8x128xf32, #tpu.memory_space<vmem>>, vector<8x128xf32>,
    return
  }
  func.func @transform_0(%arg0: i32) -> (i32, i32) {
    %c0_i32 = arith.constant 0 : i32
    %c0_i32_0 = arith.constant 0 : i32
    return %arg0, %c0_i32 : i32, i32
  }
  func.func @transform_1(%arg0: i32) -> (i32, i32) {
    %c0_i32 = arith.constant 0 : i32
    %c0_i32_0 = arith.constant 0 : i32
    %c0_i32_1 = arith.constant 0 : i32
    return %c0_i32, %c0_i32_0 : i32, i32
  }
  func.func @transform_2(%arg0: i32) -> (i32, i32) {
    %c0_i32 = arith.constant 0 : i32
    %c0_i32_0 = arith.constant 0 : i32
    %c0_i32_1 = arith.constant 0 : i32
    return %c0_i32, %c0_i32_0 : i32, i32
  }
  func.func @transform_3(%arg0: i32) -> (i32, i32, i32) {
    %c0_i32 = arith.constant 0 : i32
    %c0_i32_0 = arith.constant 0 : i32
    %c0_i32_1 = arith.constant 0 : i32
    %c0_i32_2 = arith.constant 0 : i32
    return %c0_i32, %c0_i32_0, %c0_i32_1 : i32, i32, i32
  }
  func.func @transform_4(%arg0: i32) -> (i32, i32, i32) {
    %c0_i32 = arith.constant 0 : i32
    %c0_i32_0 = arith.constant 0 : i32
    %c0_i32_1 = arith.constant 0 : i32
    %c0_i32_2 = arith.constant 0 : i32
    return %c0_i32, %c0_i32_0, %c0_i32_1 : i32, i32, i32
  }
  func.func @transform_5(%arg0: i32) -> (i32, i32) {
    %c0_i32 = arith.constant 0 : i32
    %c0_i32_0 = arith.constant 0 : i32
    %c0_i32_1 = arith.constant 0 : i32
    return %c0_i32, %c0_i32_0 : i32, i32
  }
  func.func @transform_6(%arg0: i32) -> (i32, i32) {
    %c0_i32 = arith.constant 0 : i32
    %c0_i32_0 = arith.constant 0 : i32
    %c0_i32_1 = arith.constant 0 : i32
    return %c0_i32, %c0_i32_0 : i32, i32
  }
  func.func @transform_7(%arg0: i32) -> (i32, i32) {
    %c0_i32 = arith.constant 0 : i32
    %c0_i32_0 = arith.constant 0 : i32
    return %arg0, %c0_i32 : i32, i32
  }
}

</mosaic_0001>

<bundles_post_ra>
// kernel: tpu_custom_call.1
= control target key start
LH: loop header
LB: loop body
LE: loop exit
PB: predicated region body
PF: predicated region fallthrough
CT: control target
= control target key end

     0   :  { %12 = vsyncpa [#allocation3], 0  ;;  %s709_s0 = inlined_call_operand.hbm [shape: f32[8,16], index: 0, kind: input, shape index: {}]   ;;  %s710_s1 = inlined_call_operand.hbm [shape: bf16[16,128], index: 1, kind: input, shape index: {}]   ;;  %s711_s2 = inlined_call_operand.vmem [shape: f32[1,128], index: 2, kind: input, shape index: {}]   ;;  %s712_s3 = inlined_call_operand.hbm [shape: bf16[1,128,128], index: 3, kind: input, shape index: {}]   ;;  %s713_s4 = inlined_call_operand.vmem [shape: f32[1,1,128], index: 4, kind: input, shape index: {}]   ;;  %s714_s5 = inlined_call_operand.hbm [shape: bf16[128,128], index: 5, kind: input, shape index: {}]   ;;  %s715_s6 = inlined_call_operand.vmem [shape: f32[1,128], index: 6, kind: input, shape index: {}]   ;;  %s716_s7 = inlined_call_operand.hbm [shape: f32[8,128], index: 7, kind: output, shape index: {}]  }
   0x1   :  { %13 = vsyncpa [#allocation6], 0 }
   0x2   :  { %14 = vsyncpa [#allocation9], 0 }
   0x3   :  { %15 = vsyncpa [#allocation4], 0  ;;  %s607_s24 = smov [#allocation5]  }
   0x4   :  { %s31_s25 = sshll.u32 %s607_s24, 4  ;;  %s32_s25 = int_to_ptr.vmem [resolvable:$true] %s31_s25 }
   0x5   :  { %s507_s26 = scalar_lea.vmem %s32_s25, 128  ;;  %p512_p1 = scmp.lt.s32.totalorder %s32_s25, %s32_s25 }
   0x6   :  { %p508_p0 = scmp.ne.s32.totalorder %s32_s25, %s507_s26  ;;  %p513_p2 = scmp.lt.s32.totalorder %s507_s26, %s507_s26 }
   0x8   :  { %p514_p3 = por %p513_p2, %p512_p1 }
   0xa   :  { %p515_p4 = pnand %p514_p3, %p508_p0 }
   0xc   :  { %518 = shalt.err (!%p515_p4)
}
   0xd   :  { %s608_s27 = smov 64   ;;  %s609_s28 = smov 4  }
   0xe   :  { %37 = dma.hbm_to_vmem [thread:$0]  %s710_s1, 128, %s32_s25, [#allocation6], %s608_s27, %s608_s27, %s609_s28  }
   0xf   :  { %s610_s8 = smov [#allocation2]   ;;  %s611_s10 = smov [#allocation7]  }
  0x10   :  { %s22_s9 = sshll.u32 %s610_s8, 4  ;;  %s45_s11 = sshll.u32 %s611_s10, 4  ;;  %s23_s9 = int_to_ptr.vmem [resolvable:$true] %s22_s9  ;;  %s46_s11 = int_to_ptr.vmem [resolvable:$true] %s45_s11 }
  0x11   :  { %s527_s12 = scalar_lea.vmem %s23_s9, 128  ;;  %p532_p6 = scmp.lt.s32.totalorder %s23_s9, %s23_s9 }
  0x12   :  { %p528_p5 = scmp.ne.s32.totalorder %s23_s9, %s527_s12  ;;  %p533_p7 = scmp.lt.s32.totalorder %s527_s12, %s527_s12 }
  0x14   :  { %p534_p8 = por %p533_p7, %p532_p6 }
  0x16   :  { %p535_p9 = pnand %p534_p8, %p528_p5 }
  0x18   :  { %538 = shalt.err (!%p535_p9)
}
  0x19   :  { %25 = dma.hbm_to_vmem [thread:$0]  %s709_s0, 128, %s23_s9, [#allocation3]  }
  0x1a   :  { %s547_s15 = scalar_lea.vmem %s46_s11, 1024  ;;  %p552_p11 = scmp.lt.s32.totalorder %s46_s11, %s46_s11 }
  0x1b   :  { %p548_p10 = scmp.ne.s32.totalorder %s46_s11, %s547_s15  ;;  %p553_p12 = scmp.lt.s32.totalorder %s547_s15, %s547_s15 }
  0x1d   :  { %p554_p13 = por %p553_p12, %p552_p11 }
  0x1f   :  { %p555_p0 = pnand %p554_p13, %p548_p10 }
  0x21   :  { %558 = shalt.err (!%p555_p0)
}
  0x22   :  { %51 = dma.hbm_to_vmem [thread:$0]  %s712_s3, 1024, %s46_s11, [#allocation6], %s608_s27, %s608_s27, %s609_s28  }
  0x23   :  { %s612_s17 = smov [#allocation8]  }
  0x24   :  { %s59_s18 = sshll.u32 %s612_s17, 4  ;;  %s60_s18 = int_to_ptr.vmem [resolvable:$true] %s59_s18 }
  0x25   :  { %s567_s19 = scalar_lea.vmem %s60_s18, 1024  ;;  %p572_p2 = scmp.lt.s32.totalorder %s60_s18, %s60_s18 }
  0x26   :  { %p568_p1 = scmp.ne.s32.totalorder %s60_s18, %s567_s19  ;;  %p573_p3 = scmp.lt.s32.totalorder %s567_s19, %s567_s19 }
  0x28   :  { %p574_p4 = por %p573_p3, %p572_p2 }
  0x2a   :  { %p575_p5 = pnand %p574_p4, %p568_p1 }
  0x2c   :  { %578 = shalt.err (!%p575_p5)
}
  0x2d   :  { %65 = dma.hbm_to_vmem [thread:$0]  %s714_s5, 1024, %s60_s18, [#allocation9], %s608_s27, %s608_s27, %s609_s28  }
  0x2e   :  { %599 = dma.done.wait [#allocation3], 128  }
  0x2f   :  { %600 = vsyncadd [#allocation3], 4294967168 }
  0x30   :  { %601 = dma.done.wait [#allocation6], 1152  }
  0x31   :  { %602 = vsyncadd [#allocation6], 4294966144 }
  0x32   :  { %603 = dma.done.wait [#allocation9], 1024  }
  0x33   :  { %604 = vsyncadd [#allocation9], 4294966272  ;;  %v613_v0 = vmov 0.0   ;;  %vm614_vm0 = vmmov 0   ;;  %v482_v1 = vld [vmem:[#allocation5] sm:$0xff]   ;;  %v81_v2 = vld [vmem:[#allocation2] sm:$0xff] }
  0x34   :  { %427 = vmatprep.subr.bf16.mxu0 %v613_v0  ;;  %429 = vmatprep.mubr.msk.bf16.mxu0 %vm614_vm0, %v613_v0  ;;  %v82_v3 = vpack.c.bf16 %v81_v2, %v81_v2  ;;  %vm98_vm1 = vcmask 130048   ;;  %v483_v4 = vld [vmem:[#allocation7 + $0x38] sm:$0xff]   ;;  %v484_v5 = vld [vmem:[#allocation7 + $0x30] sm:$0xff]   ;;  %v485_v6 = vld [vmem:[#allocation7 + $0x28] sm:$0xff]   ;;  %s615_s24 = smov [#allocation10]  }
  0x35   :  { %433 = vmatprep.subr.bf16.mxu1 %v613_v0  ;;  %449 = vmatprep.mubr.msk.bf16.mxu1 %vm614_vm0, %v613_v0  ;;  %v486_v7 = vld [vmem:[#allocation7 + $0x20] sm:$0xff]   ;;  %v487_v8 = vld [vmem:[#allocation7 + $0x18] sm:$0xff]   ;;  %v488_v9 = vld [vmem:[#allocation7 + $0x10] sm:$0xff]   ;;  %s375_s25 = sshll.u32 %s615_s24, 4  ;;  %s376_s25 = int_to_ptr.vmem [resolvable:$true] %s375_s25 }
  0x36   :  { %428 = vmatpush3.bf16.msra.mxu0 %v482_v1  ;;  %434 = vmatpush3.bf16.msra.mxu1 %v483_v4  ;;  %v489_v10 = vld [vmem:[#allocation7 + $0x8] sm:$0xff]   ;;  %v490_v11 = vld [vmem:[#allocation7] sm:$0xff]   ;;  %v491_v12 = vld [vmem:[#allocation8 + $0x38] sm:$0xff]   ;;  %p584_p7 = scmp.lt.s32.totalorder %s376_s25, %s376_s25 }
  0x37   :  { %453 = vmatprep.subr.bf16.mxu0 %v613_v0  ;;  %435 = vmatprep.subr.bf16.mxu1 %v613_v0  ;;  %v492_v13 = vld [vmem:[#allocation8 + $0x30] sm:$0xff]   ;;  %v493_v14 = vld [vmem:[#allocation8 + $0x28] sm:$0xff]   ;;  %v494_v15 = vld [vmem:[#allocation8 + $0x20] sm:$0xff]  }
  0x38   :  { %v495_v16 = vld [vmem:[#allocation8 + $0x18] sm:$0xff]   ;;  %v496_v17 = vld [vmem:[#allocation8 + $0x10] sm:$0xff]   ;;  %v497_v26 = vld [vmem:[#allocation8 + $0x8] sm:$0xff]  }
  0x39   :  { %430 = vmatmul.mubr.msk.bf16.vlgmr.msra.gmra.mxu0 %vm98_vm1, %v82_v3  ;;  %v386_v18 = vld [vmem:[%s711_s2] ss:$0 sm:$0xff]  ;;  %v498_v27 = vld [vmem:[#allocation8] sm:$0xff]  }
  0x3a   :  { %469 = vmatprep.mubr.msk.bf16.mxu0 %vm614_vm0, %v613_v0  ;;  %436 = vmatpush3.bf16.msra.mxu1 %v484_v5  ;;  %v389_v28 = vld [vmem:[%s713_s4] ss:$0 sm:$0xff]  ;;  %s579_s4 = scalar_lea.vmem %s376_s25, 128 }
  0x3b   :  { %437 = vmatprep.subr.bf16.mxu1 %v613_v0  ;;  %454 = vmatpush3.bf16.msra.mxu0 %v491_v12  ;;  %v398_v36 = vld [vmem:[%s715_s6] ss:$0 sm:$0xff]  ;;  %p580_p6 = scmp.ne.s32.totalorder %s376_s25, %s579_s4  ;;  %p585_p8 = scmp.lt.s32.totalorder %s579_s4, %s579_s4 }
  0x3c   :  { %455 = vmatprep.subr.bf16.mxu0 %v613_v0 }
  0x3d   :  { %p586_p9 = por %p585_p8, %p584_p7 }
  0x3e   :  { %438 = vmatpush3.bf16.msra.mxu1 %v485_v6 }
  0x3f   :  { %439 = vmatprep.subr.bf16.mxu1 %v613_v0  ;;  %456 = vmatpush3.bf16.msra.mxu0 %v492_v13  ;;  %p587_p10 = pnand %p586_p9, %p580_p6 }
  0x40   :  { %457 = vmatprep.subr.bf16.mxu0 %v613_v0 }
  0x42   :  { %440 = vmatpush3.bf16.msra.mxu1 %v486_v7 }
  0x43   :  { %441 = vmatprep.subr.bf16.mxu1 %v613_v0  ;;  %458 = vmatpush3.bf16.msra.mxu0 %v493_v14 }
  0x44   :  { %459 = vmatprep.subr.bf16.mxu0 %v613_v0 }
  0x46   :  { %442 = vmatpush3.bf16.msra.mxu1 %v487_v8 }
  0x47   :  { %443 = vmatprep.subr.bf16.mxu1 %v613_v0  ;;  %460 = vmatpush3.bf16.msra.mxu0 %v494_v15 }
  0x48   :  { %461 = vmatprep.subr.bf16.mxu0 %v613_v0 }
  0x4a   :  { %444 = vmatpush3.bf16.msra.mxu1 %v488_v9 }
  0x4b   :  { %445 = vmatprep.subr.bf16.mxu1 %v613_v0  ;;  %462 = vmatpush3.bf16.msra.mxu0 %v495_v16 }
  0x4c   :  { %463 = vmatprep.subr.bf16.mxu0 %v613_v0 }
  0x4e   :  { %446 = vmatpush3.bf16.msra.mxu1 %v489_v10 }
  0x4f   :  { %447 = vmatprep.subr.bf16.mxu1 %v613_v0  ;;  %464 = vmatpush3.bf16.msra.mxu0 %v496_v17 }
  0x50   :  { %465 = vmatprep.subr.bf16.mxu0 %v613_v0 }
  0x52   :  { %448 = vmatpush3.bf16.msra.mxu1 %v490_v11 }
  0x53   :  { %466 = vmatpush3.bf16.msra.mxu0 %v497_v26 }
  0x54   :  { %467 = vmatprep.subr.bf16.mxu0 %v613_v0 }
  0x57   :  { %468 = vmatpush3.bf16.msra.mxu0 %v498_v27 }
  0xf9   :  { %v136_v19 = vpop.f32.mrf.mxu0 }
  0xfa   :  { %v137_v20 = vadd.f32 %v386_v18, %v136_v19 }
  0xfb   :  { %v431_v21 = vpop.f32.mrf.mxu0 }
  0xfc   :  { %v142_v22 = vmax.f32 %v137_v20, 0.0 }
  0xfd   :  { %v139_v23 = vpop.f32.mrf.mxu0 }
  0xfe   :  { %v143_v24 = vpack.c.bf16 %v142_v22, %v142_v22 }
  0xff   :  { %v432_v25 = vpop.f32.mrf.mxu0 }
 0x100   :  { %450 = vmatmul.mubr.bf16.vlgmr.msra.gmra.mxu1 %v143_v24 }
 0x1c0   :  { %v249_v29 = vpop.f32.mrf.mxu1 }
 0x1c1   :  { %v250_v30 = vadd.f32 %v389_v28, %v249_v29 }
 0x1c2   :  { %v451_v31 = vpop.f32.mrf.mxu1 }
 0x1c3   :  { %v255_v32 = vmax.f32 %v250_v30, 0.0 }
 0x1c4   :  { %v252_v33 = vpop.f32.mrf.mxu1 }
 0x1c5   :  { %v256_v34 = vpack.c.bf16 %v255_v32, %v255_v32 }
 0x1c6   :  { %v452_v35 = vpop.f32.mrf.mxu1 }
 0x1c7   :  { %470 = vmatmul.mubr.bf16.vlgmr.msra.gmra.mxu0 %v256_v34 }
 0x287   :  { %v362_v37 = vpop.f32.mrf.mxu0 }
 0x288   :  { %v363_v38 = vadd.f32 %v398_v36, %v362_v37 }
 0x289   :  { %v471_v39 = vpop.f32.mrf.mxu0 }
 0x28a   :  { %368 = vst [vmem:[#allocation10] sm:$0xff] %v363_v38 }
 0x28b   :  { %v365_v40 = vpop.f32.mrf.mxu0 }
 0x28c   :  { %590 = shalt.err (!%p587_p10)
}
 0x28d   :  { %378 = dma.vmem_to_hbm [thread:$0]  %s376_s25, 128, %s716_s7, [#allocation4]   ;;  %v472_v41 = vpop.f32.mrf.mxu0 }
 0x28e   :  { %605 = dma.done.wait [#allocation4], 128  }
 0x28f   :  { %606 = vsyncadd [#allocation4], 4294967168 }
 0x290   :  { %382 = vsyncpa [#allocation3], 1 }
 0x291   :  { %383 = vsyncpa [#allocation6], 1 }
 0x292   :  { %384 = vsyncpa [#allocation9], 1 }
 0x293   :  { %385 = vsyncpa [#allocation4], 1 }

// kernel: tpu_custom_call.1
= control target key start
LH: loop header
LB: loop body
LE: loop exit
PB: predicated region body
PF: predicated region fallthrough
CT: control target
= control target key end

     0   :  { %12 = vsyncpa [#allocation3], 0  ;;  %s709_s0 = inlined_call_operand.hbm [shape: f32[8,16], index: 0, kind: input, shape index: {}]   ;;  %s710_s1 = inlined_call_operand.hbm [shape: bf16[16,128], index: 1, kind: input, shape index: {}]   ;;  %s711_s2 = inlined_call_operand.vmem [shape: f32[1,128], index: 2, kind: input, shape index: {}]   ;;  %s712_s3 = inlined_call_operand.hbm [shape: bf16[1,128,128], index: 3, kind: input, shape index: {}]   ;;  %s713_s4 = inlined_call_operand.vmem [shape: f32[1,1,128], index: 4, kind: input, shape index: {}]   ;;  %s714_s5 = inlined_call_operand.hbm [shape: bf16[128,128], index: 5, kind: input, shape index: {}]   ;;  %s715_s6 = inlined_call_operand.vmem [shape: f32[1,128], index: 6, kind: input, shape index: {}]   ;;  %s716_s7 = inlined_call_operand.hbm [shape: f32[8,128], index: 7, kind: output, shape index: {}]  }
   0x1   :  { %13 = vsyncpa [#allocation6], 0 }
   0x2   :  { %14 = vsyncpa [#allocation9], 0 }
   0x3   :  { %15 = vsyncpa [#allocation4], 0  ;;  %s607_s24 = smov [#allocation5]  }
   0x4   :  { %s31_s25 = sshll.u32 %s607_s24, 4  ;;  %s32_s25 = int_to_ptr.vmem [resolvable:$true] %s31_s25 }
   0x5   :  { %s507_s26 = scalar_lea.vmem %s32_s25, 128  ;;  %p512_p1 = scmp.lt.s32.totalorder %s32_s25, %s32_s25 }
   0x6   :  { %p508_p0 = scmp.ne.s32.totalorder %s32_s25, %s507_s26  ;;  %p513_p2 = scmp.lt.s32.totalorder %s507_s26, %s507_s26 }
   0x8   :  { %p514_p3 = por %p513_p2, %p512_p1 }
   0xa   :  { %p515_p4 = pnand %p514_p3, %p508_p0 }
   0xc   :  { %518 = shalt.err (!%p515_p4)
}
   0xd   :  { %s608_s27 = smov 64   ;;  %s609_s28 = smov 4  }
   0xe   :  { %37 = dma.hbm_to_vmem [thread:$0]  %s710_s1, 128, %s32_s25, [#allocation6], %s608_s27, %s608_s27, %s609_s28  }
   0xf   :  { %s610_s8 = smov [#allocation2]   ;;  %s611_s10 = smov [#allocation7]  }
  0x10   :  { %s22_s9 = sshll.u32 %s610_s8, 4  ;;  %s45_s11 = sshll.u32 %s611_s10, 4  ;;  %s23_s9 = int_to_ptr.vmem [resolvable:$true] %s22_s9  ;;  %s46_s11 = int_to_ptr.vmem [resolvable:$true] %s45_s11 }
  0x11   :  { %s527_s12 = scalar_lea.vmem %s23_s9, 128  ;;  %p532_p6 = scmp.lt.s32.totalorder %s23_s9, %s23_s9 }
  0x12   :  { %p528_p5 = scmp.ne.s32.totalorder %s23_s9, %s527_s12  ;;  %p533_p7 = scmp.lt.s32.totalorder %s527_s12, %s527_s12 }
  0x14   :  { %p534_p8 = por %p533_p7, %p532_p6 }
  0x16   :  { %p535_p9 = pnand %p534_p8, %p528_p5 }
  0x18   :  { %538 = shalt.err (!%p535_p9)
}
  0x19   :  { %25 = dma.hbm_to_vmem [thread:$0]  %s709_s0, 128, %s23_s9, [#allocation3]  }
  0x1a   :  { %s547_s15 = scalar_lea.vmem %s46_s11, 1024  ;;  %p552_p11 = scmp.lt.s32.totalorder %s46_s11, %s46_s11 }
  0x1b   :  { %p548_p10 = scmp.ne.s32.totalorder %s46_s11, %s547_s15  ;;  %p553_p12 = scmp.lt.s32.totalorder %s547_s15, %s547_s15 }
  0x1d   :  { %p554_p13 = por %p553_p12, %p552_p11 }
  0x1f   :  { %p555_p0 = pnand %p554_p13, %p548_p10 }
  0x21   :  { %558 = shalt.err (!%p555_p0)
}
  0x22   :  { %51 = dma.hbm_to_vmem [thread:$0]  %s712_s3, 1024, %s46_s11, [#allocation6], %s608_s27, %s608_s27, %s609_s28  }
  0x23   :  { %s612_s17 = smov [#allocation8]  }
  0x24   :  { %s59_s18 = sshll.u32 %s612_s17, 4  ;;  %s60_s18 = int_to_ptr.vmem [resolvable:$true] %s59_s18 }
  0x25   :  { %s567_s19 = scalar_lea.vmem %s60_s18, 1024  ;;  %p572_p2 = scmp.lt.s32.totalorder %s60_s18, %s60_s18 }
  0x26   :  { %p568_p1 = scmp.ne.s32.totalorder %s60_s18, %s567_s19  ;;  %p573_p3 = scmp.lt.s32.totalorder %s567_s19, %s567_s19 }
  0x28   :  { %p574_p4 = por %p573_p3, %p572_p2 }
  0x2a   :  { %p575_p5 = pnand %p574_p4, %p568_p1 }
  0x2c   :  { %578 = shalt.err (!%p575_p5)
}
  0x2d   :  { %65 = dma.hbm_to_vmem [thread:$0]  %s714_s5, 1024, %s60_s18, [#allocation9], %s608_s27, %s608_s27, %s609_s28  }
  0x2e   :  { %599 = dma.done.wait [#allocation3], 128  }
  0x2f   :  { %600 = vsyncadd [#allocation3], 4294967168 }
  0x30   :  { %601 = dma.done.wait [#allocation6], 1152  }
  0x31   :  { %602 = vsyncadd [#allocation6], 4294966144 }
  0x32   :  { %603 = dma.done.wait [#allocation9], 1024  }
  0x33   :  { %604 = vsyncadd [#allocation9], 4294966272  ;;  %v613_v0 = vmov 0.0   ;;  %vm614_vm0 = vmmov 0   ;;  %v482_v1 = vld [vmem:[#allocation5] sm:$0xff]   ;;  %v81_v2 = vld [vmem:[#allocation2] sm:$0xff] }
  0x34   :  { %427 = vmatprep.subr.bf16.mxu0 %v613_v0  ;;  %429 = vmatprep.mubr.msk.bf16.mxu0 %vm614_vm0, %v613_v0  ;;  %v82_v3 = vpack.c.bf16 %v81_v2, %v81_v2  ;;  %vm98_vm1 = vcmask 130048   ;;  %v483_v4 = vld [vmem:[#allocation7 + $0x38] sm:$0xff]   ;;  %v484_v5 = vld [vmem:[#allocation7 + $0x30] sm:$0xff]   ;;  %v485_v6 = vld [vmem:[#allocation7 + $0x28] sm:$0xff]   ;;  %s615_s24 = smov [#allocation10]  }
  0x35   :  { %433 = vmatprep.subr.bf16.mxu1 %v613_v0  ;;  %449 = vmatprep.mubr.msk.bf16.mxu1 %vm614_vm0, %v613_v0  ;;  %v486_v7 = vld [vmem:[#allocation7 + $0x20] sm:$0xff]   ;;  %v487_v8 = vld [vmem:[#allocation7 + $0x18] sm:$0xff]   ;;  %v488_v9 = vld [vmem:[#allocation7 + $0x10] sm:$0xff]   ;;  %s375_s25 = sshll.u32 %s615_s24, 4  ;;  %s376_s25 = int_to_ptr.vmem [resolvable:$true] %s375_s25 }
  0x36   :  { %428 = vmatpush3.bf16.msra.mxu0 %v482_v1  ;;  %434 = vmatpush3.bf16.msra.mxu1 %v483_v4  ;;  %v489_v10 = vld [vmem:[#allocation7 + $0x8] sm:$0xff]   ;;  %v490_v11 = vld [vmem:[#allocation7] sm:$0xff]   ;;  %v491_v12 = vld [vmem:[#allocation8 + $0x38] sm:$0xff]   ;;  %p584_p7 = scmp.lt.s32.totalorder %s376_s25, %s376_s25 }
  0x37   :  { %453 = vmatprep.subr.bf16.mxu0 %v613_v0  ;;  %435 = vmatprep.subr.bf16.mxu1 %v613_v0  ;;  %v492_v13 = vld [vmem:[#allocation8 + $0x30] sm:$0xff]   ;;  %v493_v14 = vld [vmem:[#allocation8 + $0x28] sm:$0xff]   ;;  %v494_v15 = vld [vmem:[#allocation8 + $0x20] sm:$0xff]  }
  0x38   :  { %v495_v16 = vld [vmem:[#allocation8 + $0x18] sm:$0xff]   ;;  %v496_v17 = vld [vmem:[#allocation8 + $0x10] sm:$0xff]   ;;  %v497_v26 = vld [vmem:[#allocation8 + $0x8] sm:$0xff]  }
  0x39   :  { %430 = vmatmul.mubr.msk.bf16.vlgmr.msra.gmra.mxu0 %vm98_vm1, %v82_v3  ;;  %v386_v18 = vld [vmem:[%s711_s2] ss:$0 sm:$0xff]  ;;  %v498_v27 = vld [vmem:[#allocation8] sm:$0xff]  }
  0x3a   :  { %469 = vmatprep.mubr.msk.bf16.mxu0 %vm614_vm0, %v613_v0  ;;  %436 = vmatpush3.bf16.msra.mxu1 %v484_v5  ;;  %v389_v28 = vld [vmem:[%s713_s4] ss:$0 sm:$0xff]  ;;  %s579_s4 = scalar_lea.vmem %s376_s25, 128 }
  0x3b   :  { %437 = vmatprep.subr.bf16.mxu1 %v613_v0  ;;  %454 = vmatpush3.bf16.msra.mxu0 %v491_v12  ;;  %v398_v36 = vld [vmem:[%s715_s6] ss:$0 sm:$0xff]  ;;  %p580_p6 = scmp.ne.s32.totalorder %s376_s25, %s579_s4  ;;  %p585_p8 = scmp.lt.s32.totalorder %s579_s4, %s579_s4 }
  0x3c   :  { %455 = vmatprep.subr.bf16.mxu0 %v613_v0 }
  0x3d   :  { %p586_p9 = por %p585_p8, %p584_p7 }
  0x3e   :  { %438 = vmatpush3.bf16.msra.mxu1 %v485_v6 }
  0x3f   :  { %439 = vmatprep.subr.bf16.mxu1 %v613_v0  ;;  %456 = vmatpush3.bf16.msra.mxu0 %v492_v13  ;;  %p587_p10 = pnand %p586_p9, %p580_p6 }
  0x40   :  { %457 = vmatprep.subr.bf16.mxu0 %v613_v0 }
  0x42   :  { %440 = vmatpush3.bf16.msra.mxu1 %v486_v7 }
  0x43   :  { %441 = vmatprep.subr.bf16.mxu1 %v613_v0  ;;  %458 = vmatpush3.bf16.msra.mxu0 %v493_v14 }
  0x44   :  { %459 = vmatprep.subr.bf16.mxu0 %v613_v0 }
  0x46   :  { %442 = vmatpush3.bf16.msra.mxu1 %v487_v8 }
  0x47   :  { %443 = vmatprep.subr.bf16.mxu1 %v613_v0  ;;  %460 = vmatpush3.bf16.msra.mxu0 %v494_v15 }
  0x48   :  { %461 = vmatprep.subr.bf16.mxu0 %v613_v0 }
  0x4a   :  { %444 = vmatpush3.bf16.msra.mxu1 %v488_v9 }
  0x4b   :  { %445 = vmatprep.subr.bf16.mxu1 %v613_v0  ;;  %462 = vmatpush3.bf16.msra.mxu0 %v495_v16 }
  0x4c   :  { %463 = vmatprep.subr.bf16.mxu0 %v613_v0 }
  0x4e   :  { %446 = vmatpush3.bf16.msra.mxu1 %v489_v10 }
  0x4f   :  { %447 = vmatprep.subr.bf16.mxu1 %v613_v0  ;;  %464 = vmatpush3.bf16.msra.mxu0 %v496_v17 }
  0x50   :  { %465 = vmatprep.subr.bf16.mxu0 %v613_v0 }
  0x52   :  { %448 = vmatpush3.bf16.msra.mxu1 %v490_v11 }
  0x53   :  { %466 = vmatpush3.bf16.msra.mxu0 %v497_v26 }
  0x54   :  { %467 = vmatprep.subr.bf16.mxu0 %v613_v0 }
  0x57   :  { %468 = vmatpush3.bf16.msra.mxu0 %v498_v27 }
  0xf9   :  { %v136_v19 = vpop.f32.mrf.mxu0 }
  0xfa   :  { %v137_v20 = vadd.f32 %v386_v18, %v136_v19 }
  0xfb   :  { %v431_v21 = vpop.f32.mrf.mxu0 }
  0xfc   :  { %v142_v22 = vmax.f32 %v137_v20, 0.0 }
  0xfd   :  { %v139_v23 = vpop.f32.mrf.mxu0 }
  0xfe   :  { %v143_v24 = vpack.c.bf16 %v142_v22, %v142_v22 }
  0xff   :  { %v432_v25 = vpop.f32.mrf.mxu0 }
 0x100   :  { %450 = vmatmul.mubr.bf16.vlgmr.msra.gmra.mxu1 %v143_v24 }
 0x1c0   :  { %v249_v29 = vpop.f32.mrf.mxu1 }
 0x1c1   :  { %v250_v30 = vadd.f32 %v389_v28, %v249_v29 }
 0x1c2   :  { %v451_v31 = vpop.f32.mrf.mxu1 }
 0x1c3   :  { %v255_v32 = vmax.f32 %v250_v30, 0.0 }
 0x1c4   :  { %v252_v33 = vpop.f32.mrf.mxu1 }
 0x1c5   :  { %v256_v34 = vpack.c.bf16 %v255_v32, %v255_v32 }
 0x1c6   :  { %v452_v35 = vpop.f32.mrf.mxu1 }
 0x1c7   :  { %470 = vmatmul.mubr.bf16.vlgmr.msra.gmra.mxu0 %v256_v34 }
 0x287   :  { %v362_v37 = vpop.f32.mrf.mxu0 }
 0x288   :  { %v363_v38 = vadd.f32 %v398_v36, %v362_v37 }
 0x289   :  { %v471_v39 = vpop.f32.mrf.mxu0 }
 0x28a   :  { %368 = vst [vmem:[#allocation10] sm:$0xff] %v363_v38 }
 0x28b   :  { %v365_v40 = vpop.f32.mrf.mxu0 }
 0x28c   :  { %590 = shalt.err (!%p587_p10)
}
 0x28d   :  { %378 = dma.vmem_to_hbm [thread:$0]  %s376_s25, 128, %s716_s7, [#allocation4]   ;;  %v472_v41 = vpop.f32.mrf.mxu0 }
 0x28e   :  { %605 = dma.done.wait [#allocation4], 128  }
 0x28f   :  { %606 = vsyncadd [#allocation4], 4294967168 }
 0x290   :  { %382 = vsyncpa [#allocation3], 1 }
 0x291   :  { %383 = vsyncpa [#allocation6], 1 }
 0x292   :  { %384 = vsyncpa [#allocation9], 1 }
 0x293   :  { %385 = vsyncpa [#allocation4], 1 }

</bundles_post_ra>
